<compile_context>
chip_gen: v6e
topology: v6e:2x2x1
jax: 0.10.0
libtpu: 0.0.40
codegen_flags: <defaults>
</compile_context>

<pallas_src>
import functools

import jax
import jax.numpy as jnp
from jax import lax
from jax.experimental import pallas as pl
from jax.experimental.pallas import tpu as pltpu

_LANE = 128
_MAX_COL_TILE = 2048                       # 8 KiB contiguous f32 per DMA row
_MAX_ROW_TILE = 1024
_TARGET_BLOCK_BYTES = 2 * 1024 * 1024      # ~2 MiB/input block; 2 in x 2 bufs = 8 MiB


def _round_up(x, m):
    return (x + m - 1) // m * m


def _cost_kernel(y_ref, d_ref, o_ref, acc_ref, *, c_p, c_h):
    """Streams (row_tile, col_tile) blocks of y/d, accumulates a lane-dense
    (row_tile, 128) partial sum in VMEM, and reduces it to an (8, 128) tile
    once per row-block on the last column step."""
    j = pl.program_id(1)

    @pl.when(j == 0)
    def _init():
        acc_ref[...] = jnp.zeros_like(acc_ref)

    diff = y_ref[...].astype(jnp.float32) - d_ref[...].astype(jnp.float32)
    # c_p * max(diff, 0) + c_h * max(-diff, 0)  ==  diff * (diff > 0 ? c_p : -c_h)
    cost = diff * jnp.where(diff > 0, jnp.float32(c_p), jnp.float32(-c_h))

    # Fold lane-blocks of this tile into the (row_tile, 128) running sum
    # (lane-aligned slices -> pure VPU vreg adds, hidden under the DMA).
    lane_blocks = cost.shape[1] // _LANE
    lane_sum = cost[:, 0:_LANE]
    for k in range(1, lane_blocks):        # static unroll
        lane_sum = lane_sum + cost[:, k * _LANE:(k + 1) * _LANE]
    acc_ref[...] += lane_sum

    # Final sublane-block reduce -> (8, 128), once per row-block.
    @pl.when(j == pl.num_programs(1) - 1)
    def _finalize():
        row_blocks = acc_ref.shape[0] // 8

        def body(r, red):
            start = pl.multiple_of(r * 8, 8)
            return red + acc_ref[pl.ds(start, 8), :]

        o_ref[...] = lax.fori_loop(1, row_blocks, body, acc_ref[0:8, :])


def cost_function(y, d, c_p, c_h):
    """Pallas equivalent of CostFunction.forward.

    y, d: (n_product, n_obs) arrays.  Returns a 0-d float32 scalar.
    """
    n_product, n_obs = y.shape
    assert d.shape == (n_product, n_obs)

    itemsize = jnp.dtype(y.dtype).itemsize
    sub = {4: 8, 2: 16, 1: 32}.get(itemsize, 8)   # sublane multiple per dtype

    # --- choose large, lane-dense tiles (this kernel is HBM-bandwidth bound) ---
    padded_obs = _round_up(n_obs, _LANE)
    col_tile = min(padded_obs, _MAX_COL_TILE)
    padded_obs = _round_up(padded_obs, col_tile)

    padded_rows = _round_up(n_product, sub)
    row_tile = max(sub, min(_MAX_ROW_TILE, _TARGET_BLOCK_BYTES // (col_tile * itemsize)))
    row_tile = _round_up(row_tile, sub)
    row_tile = min(row_tile, padded_rows)
    padded_rows = _round_up(padded_rows, row_tile)

    pad_r, pad_c = padded_rows - n_product, padded_obs - n_obs
    if pad_r or pad_c:
        # zero padding is free: diff == 0 -> cost == 0
        y = jnp.pad(y, ((0, pad_r), (0, pad_c)))
        d = jnp.pad(d, ((0, pad_r), (0, pad_c)))

    grid = (padded_rows // row_tile, padded_obs // col_tile)

    # TODO(synk): pass c_p/c_h via SMEM scalar-prefetch and add a custom_vjp if
    # they ever need to be runtime-varying / differentiated; the PyTorch module
    # treats them as constructor constants, so they are baked in here.
    kernel = functools.partial(_cost_kernel, c_p=float(c_p), c_h=float(c_h))

    partials = pl.pallas_call(
        kernel,
        out_shape=jax.ShapeDtypeStruct((grid[0] * 8, _LANE), jnp.float32),
        grid_spec=pltpu.PrefetchScalarGridSpec(
            num_scalar_prefetch=0,
            grid=grid,
            in_specs=[
                pl.BlockSpec((row_tile, col_tile), lambda i, j: (i, j)),
                pl.BlockSpec((row_tile, col_tile), lambda i, j: (i, j)),
            ],
            # one lane-dense (8, 128) partial-sum tile per row-block
            out_specs=pl.BlockSpec((8, _LANE), lambda i, j: (i, 0)),
            scratch_shapes=[pltpu.VMEM((row_tile, _LANE), jnp.float32)],
        ),
        compiler_params=pltpu.CompilerParams(
            # rows are independent (megacore-parallel on v7x); columns are the
            # sequential reduction axis.
            dimension_semantics=("parallel", "arbitrary"),
        ),
    )(y, d)

    # tiny final reduction of the per-row-block partial sums
    return jnp.sum(partials)


def cost_function_ref(y, d, c_p, c_h):
    diff = y.astype(jnp.float32) - d.astype(jnp.float32)
    return jnp.sum(jnp.maximum(diff, 0.0) * c_p + jnp.maximum(-diff, 0.0) * c_h)


if __name__ == "__main__":
    key = jax.random.PRNGKey(0)
    k1, k2, k3, k4 = jax.random.split(key, 4)

    c_p, c_h = 2.0, 0.5  # module "parameters" (constructor constants)

    # Case 1: small, tile-aligned shape -> single-block grid.
    y1 = jax.random.normal(k1, (16, 128), dtype=jnp.float32) * 3.0 + 10.0
    d1 = jax.random.normal(k2, (16, 128), dtype=jnp.float32) * 3.0 + 10.0
    out1 = jax.block_until_ready(cost_function(y1, d1, c_p, c_h))
    ref1 = cost_function_ref(y1, d1, c_p, c_h)
    assert jnp.allclose(out1, ref1, rtol=1e-4, atol=1e-2), (out1, ref1)

    # Case 2: unaligned shape exercising the zero-padding path.
    y2 = jax.random.normal(k3, (13, 200), dtype=jnp.float32) * 3.0 + 10.0
    d2 = jax.random.normal(k4, (13, 200), dtype=jnp.float32) * 3.0 + 10.0
    out2 = jax.block_until_ready(cost_function(y2, d2, c_p, c_h))
    ref2 = cost_function_ref(y2, d2, c_p, c_h)
    assert jnp.allclose(out2, ref2, rtol=1e-4, atol=1e-2), (out2, ref2)

    print("KERNEL_OK")
</pallas_src>

<mosaic_0001>
module attributes {stable_mosaic.version = 11 : i64} {
  func.func @_cost_kernel(%arg0: i32, %arg1: i32, %arg2: memref<16x128xf32, #tpu.memory_space<vmem>>, %arg3: memref<16x128xf32, #tpu.memory_space<vmem>>, %arg4: memref<8x128xf32, #tpu.memory_space<vmem>>, %arg5: memref<16x128xf32, #tpu.memory_space<vmem>>) attributes {dimension_semantics = [#tpu.dimension_semantics<parallel>, #tpu.dimension_semantics<arbitrary>], iteration_bounds = array<i64: 1, 1>, scalar_prefetch = 0 : i64, scratch_operands = 1 : i64, tpu.core_type = #tpu.core_type<tc>, window_params = [{transform_indices = @transform_0, window_bounds = array<i64: 16, 128>}, {transform_indices = @transform_1, window_bounds = array<i64: 16, 128>}, {transform_indices = @transform_2, window_bounds = array<i64: 8, 128>}]} {
    %c0_i32 = arith.constant 0 : i32
    %0 = arith.cmpi eq, %arg1, %c0_i32 : i32
    %1 = arith.extui %0 : i1 to i32
    %c0_i32_0 = arith.constant 0 : i32
    %2 = arith.cmpi ne, %1, %c0_i32_0 : i32
    scf.if %2 {
      %cst_12 = arith.constant 0.000000e+00 : f32
      %18 = vector.broadcast %cst_12 : f32 to vector<16x128xf32>
      %c0_13 = arith.constant 0 : index
      %c0_14 = arith.constant 0 : index
      %19 = vector.load %arg5[%c0_13, %c0_14] : memref<16x128xf32, #tpu.memory_space<vmem>>, vector<16x128xf32>
      tpu.vector_store %arg5[%c0_13, %c0_14], %18 {strides = array<i32>} : memref<16x128xf32, #tpu.memory_space<vmem>>, vector<16x128xf32>,
    } else {
    }
    %c0 = arith.constant 0 : index
    %c0_1 = arith.constant 0 : index
    %3 = vector.load %arg2[%c0, %c0_1] : memref<16x128xf32, #tpu.memory_space<vmem>>, vector<16x128xf32>
    %c0_2 = arith.constant 0 : index
    %c0_3 = arith.constant 0 : index
    %4 = vector.load %arg3[%c0_2, %c0_3] : memref<16x128xf32, #tpu.memory_space<vmem>>, vector<16x128xf32>
    %5 = arith.subf %3, %4 : vector<16x128xf32>
    %cst = arith.constant 0.000000e+00 : f32
    %6 = vector.broadcast %cst : f32 to vector<16x128xf32>
    %7 = arith.cmpf ogt, %5, %6 : vector<16x128xf32>
    %cst_4 = arith.constant 2.000000e+00 : f32
    %cst_5 = arith.constant -5.000000e-01 : f32
    %8 = vector.broadcast %cst_4 : f32 to vector<16x128xf32>
    %9 = vector.broadcast %cst_5 : f32 to vector<16x128xf32>
    %10 = arith.select %7, %8, %9 : vector<16x128xi1>, vector<16x128xf32>
    %11 = arith.mulf %5, %10 : vector<16x128xf32>
    %c0_6 = arith.constant 0 : index
    %c0_7 = arith.constant 0 : index
    %12 = vector.load %arg5[%c0_6, %c0_7] : memref<16x128xf32, #tpu.memory_space<vmem>>, vector<16x128xf32>
    %13 = arith.addf %12, %11 : vector<16x128xf32>
    %c0_8 = arith.constant 0 : index
    %c0_9 = arith.constant 0 : index
    %14 = vector.load %arg5[%c0_8, %c0_9] : memref<16x128xf32, #tpu.memory_space<vmem>>, vector<16x128xf32>
    tpu.vector_store %arg5[%c0_8, %c0_9], %13 {strides = array<i32>} : memref<16x128xf32, #tpu.memory_space<vmem>>, vector<16x128xf32>,
    %c0_i32_10 = arith.constant 0 : i32
    %15 = arith.cmpi eq, %arg1, %c0_i32_10 : i32
    %16 = arith.extui %15 : i1 to i32
    %c0_i32_11 = arith.constant 0 : i32
    %17 = arith.cmpi ne, %16, %c0_i32_11 : i32
    scf.if %17 {
      %c0_12 = arith.constant 0 : index
      %c0_13 = arith.constant 0 : index
      %18 = vector.load %arg5[%c0_12, %c0_13] : memref<16x128xf32, #tpu.memory_space<vmem>>, vector<8x128xf32>
      %c1_i32 = arith.constant 1 : i32
      %c8_i32 = arith.constant 8 : i32
      %19 = arith.muli %c1_i32, %c8_i32 : i32
      %20 = tpu.assume_multiple %19, 8 : i32
      %21 = arith.index_cast %20 : i32 to index
      %c0_14 = arith.constant 0 : index
      %22 = vector.load %arg5[%21, %c0_14] : memref<16x128xf32, #tpu.memory_space<vmem>>, vector<8x128xf32>
      %23 = arith.addf %18, %22 : vector<8x128xf32>
      %c1_i32_15 = arith.constant 1 : i32
      %c0_16 = arith.constant 0 : index
      %c0_17 = arith.constant 0 : index
      %24 = vector.load %arg4[%c0_16, %c0_17] : memref<8x128xf32, #tpu.memory_space<vmem>>, vector<8x128xf32>
      tpu.vector_store %arg4[%c0_16, %c0_17], %23 {strides = array<i32>} : memref<8x128xf32, #tpu.memory_space<vmem>>, vector<8x128xf32>,
    } else {
    }
    return
  }
  func.func @transform_0(%arg0: i32, %arg1: i32) -> (i32, i32) {
    %c0_i32 = arith.constant 0 : i32
    return %arg0, %arg1 : i32, i32
  }
  func.func @transform_1(%arg0: i32, %arg1: i32) -> (i32, i32) {
    %c0_i32 = arith.constant 0 : i32
    return %arg0, %arg1 : i32, i32
  }
  func.func @transform_2(%arg0: i32, %arg1: i32) -> (i32, i32) {
    %c0_i32 = arith.constant 0 : i32
    %c0_i32_0 = arith.constant 0 : i32
    return %arg0, %c0_i32 : i32, i32
  }
}

</mosaic_0001>

<bundles_post_ra>
// kernel: tpu_custom_call.1
= control target key start
LH: loop header
LB: loop body
LE: loop exit
PB: predicated region body
PF: predicated region fallthrough
CT: control target
= control target key end

     0   :  { %7 = vsyncpa [#allocation4], 0  ;;  %s190_s0 = inlined_call_operand.hbm [shape: f32[16,128], index: 0, kind: input, shape index: {}]   ;;  %s191_s1 = inlined_call_operand.hbm [shape: f32[16,128], index: 1, kind: input, shape index: {}]   ;;  %s192_s2 = inlined_call_operand.hbm [shape: f32[8,128], index: 2, kind: output, shape index: {}]  }
   0x1   :  { %8 = vsyncpa [#allocation7], 0 }
   0x2   :  { %9 = vsyncpa [#allocation5], 0  ;;  %s160_s9 = smov [#allocation3]  }
   0x3   :  { %s15_s10 = sshll.u32 %s160_s9, 4  ;;  %s16_s10 = int_to_ptr.vmem [resolvable:$true] %s15_s10 }
   0x4   :  { %s102_s11 = scalar_lea.vmem %s16_s10, 256  ;;  %p107_p1 = scmp.lt.s32.totalorder %s16_s10, %s16_s10 }
   0x5   :  { %p103_p0 = scmp.ne.s32.totalorder %s16_s10, %s102_s11  ;;  %p108_p2 = scmp.lt.s32.totalorder %s102_s11, %s102_s11 }
   0x7   :  { %p109_p3 = por %p108_p2, %p107_p1 }
   0x9   :  { %p110_p4 = pnand %p109_p3, %p103_p0 }
   0xb   :  { %113 = shalt.err (!%p110_p4)
}
   0xc   :  { %s161_s12 = smov 128   ;;  %s162_s13 = smov 8  }
   0xd   :  { %21 = dma.hbm_to_vmem [thread:$0]  %s190_s0, 256, %s16_s10, [#allocation4], %s161_s12, %s161_s12, %s162_s13  }
   0xe   :  { %s163_s16 = smov [#allocation6]  }
   0xf   :  { %s27_s17 = sshll.u32 %s163_s16, 4  ;;  %s28_s17 = int_to_ptr.vmem [resolvable:$true] %s27_s17 }
  0x10   :  { %s122_s18 = scalar_lea.vmem %s28_s17, 256  ;;  %p127_p6 = scmp.lt.s32.totalorder %s28_s17, %s28_s17 }
  0x11   :  { %p123_p5 = scmp.ne.s32.totalorder %s28_s17, %s122_s18  ;;  %p128_p7 = scmp.lt.s32.totalorder %s122_s18, %s122_s18 }
  0x13   :  { %p129_p8 = por %p128_p7, %p127_p6 }
  0x15   :  { %p130_p9 = pnand %p129_p8, %p123_p5 }
  0x17   :  { %133 = shalt.err (!%p130_p9)
}
  0x18   :  { %33 = dma.hbm_to_vmem [thread:$0]  %s191_s1, 256, %s28_s17, [#allocation7], %s161_s12, %s161_s12, %s162_s13  }
  0x19   :  { %154 = dma.done.wait [#allocation4], 256  }
  0x1a   :  { %155 = vsyncadd [#allocation4], 4294967040 }
  0x1b   :  { %156 = dma.done.wait [#allocation7], 256  }
  0x1c   :  { %157 = vsyncadd [#allocation7], 4294967040  ;;  %v46_v0 = vld [vmem:[#allocation3] sm:$0xff]  ;;  %v47_v1 = vld [vmem:[#allocation3 + $0x8] sm:$0xff]  ;;  %v164_v6 = vmov -0.5   ;;  %s165_s0 = smov [#allocation8]  }
  0x1d   :  { %v48_v2 = vld [vmem:[#allocation6] sm:$0xff]  ;;  %v49_v3 = vld [vmem:[#allocation6 + $0x8] sm:$0xff]  ;;  %s78_s21 = sshll.u32 %s165_s0, 4  ;;  %s79_s21 = int_to_ptr.vmem [resolvable:$true] %s78_s21 }
  0x1e   :  { %v50_v4 = vsub.f32 %v46_v0, %v48_v2  ;;  %v51_v5 = vsub.f32 %v47_v1, %v49_v3  ;;  %s134_s1 = scalar_lea.vmem %s79_s21, 128  ;;  %p139_p11 = scmp.lt.s32.totalorder %s79_s21, %s79_s21 }
  0x1f   :  { %p135_p10 = scmp.ne.s32.totalorder %s79_s21, %s134_s1  ;;  %p140_p12 = scmp.lt.s32.totalorder %s134_s1, %s134_s1 }
  0x20   :  { %vm52_vm0 = vcmp.gt.f32.partialorder %v50_v4, 0.0  ;;  %vm53_vm1 = vcmp.gt.f32.partialorder %v51_v5, 0.0 }
  0x21   :  { %v54_v7 = vsel %vm52_vm0, 2.0, %v164_v6  ;;  %v55_v8 = vsel %vm53_vm1, 2.0, %v164_v6  ;;  %p141_p13 = por %p140_p12, %p139_p11 }
  0x22   :  { %v56_v9 = vmul.f32 %v54_v7, %v50_v4  ;;  %v57_v10 = vmul.f32 %v55_v8, %v51_v5 }
  0x23   :  { %p142_p0 = pnand %p141_p13, %p135_p10 }
  0x24   :  { %v70_v11 = vadd.f32 %v57_v10, %v56_v9 }
  0x26   :  { %71 = vst [vmem:[#allocation8] sm:$0xff] %v70_v11 }
  0x27   :  { %145 = shalt.err (!%p142_p0)
}
  0x28   :  { %81 = dma.vmem_to_hbm [thread:$0]  %s79_s21, 128, %s192_s2, [#allocation5]  }
  0x29   :  { %158 = dma.done.wait [#allocation5], 128  }
  0x2a   :  { %159 = vsyncadd [#allocation5], 4294967168 }
  0x2b   :  { %85 = vsyncpa [#allocation4], 1 }
  0x2c   :  { %86 = vsyncpa [#allocation7], 1 }
  0x2d   :  { %87 = vsyncpa [#allocation5], 1 }

</bundles_post_ra>
